<compile_context>
chip_gen: v7x
topology: tpu7x:2x2x1
jax: 0.10.0
libtpu: 0.0.40
codegen_flags: <defaults>
</compile_context>

<pallas_src>
import jax
import jax.numpy as jnp
import numpy as np
from jax.experimental import pallas as pl
from jax.experimental.pallas import tpu as pltpu


# Above this size the gridless whole-array VMEM copy is not safe on v7x
# (scoped-VMEM default 32 MiB, in+out double-buffered); fall back to the
# zero-HLO path.
_PALLAS_DEBUG_MAX_BYTES = 8 * 1024 * 1024


# ----------------------------------------------------------------------------
# Pallas debug/compat path: minimal gridless identity custom call.
# ----------------------------------------------------------------------------
def _identity_kernel(unc_ref, out_ref):
    out_ref[...] = unc_ref[...]


def _uncertainty_pallas_identity(unc):
    """Minimal Pallas identity copy (debug/compat only; strictly slower than
    returning the existing buffer)."""
    return pl.pallas_call(
        _identity_kernel,
        out_shape=jax.ShapeDtypeStruct(unc.shape, unc.dtype),
        in_specs=[pl.BlockSpec(memory_space=pltpu.MemorySpace.VMEM)],
        out_specs=pl.BlockSpec(memory_space=pltpu.MemorySpace.VMEM),
        # NOTE: no input_output_aliases — do not donate the caller's buffer.
    )(unc)


# ----------------------------------------------------------------------------
# Primary API: faithful forward = pure dict lookup, zero HLO emitted.
# ----------------------------------------------------------------------------
def uncertainty_forward(model_output, *, use_pallas=False):
    """JAX equivalent of Uncertainty.forward.

    Default path emits NO kernel (pure dict lookup).  `use_pallas=True`
    routes through a minimal Pallas identity call for debugging/compat, with
    a VMEM-size guard that falls back to the zero-HLO path for large arrays.
    """
    unc = model_output["potential_energy_uncertainty"]
    if not use_pallas:
        return unc

    nbytes = int(np.prod(unc.shape)) * jnp.dtype(unc.dtype).itemsize
    if nbytes > _PALLAS_DEBUG_MAX_BYTES:
        # Too big for a gridless whole-array VMEM copy on v7x; the correct
        # answer is still "no kernel".
        return unc
    return _uncertainty_pallas_identity(unc)


if __name__ == "__main__":
    key = jax.random.PRNGKey(0)
    k_unc, k_energy = jax.random.split(key)

    B, N = 8, 128  # batch=8 structures, 128 lane-dense uncertainty components

    unc = jax.random.normal(k_unc, (B, N), dtype=jnp.float32)
    model_output = {
        # extra keys mimic a real model-output dict; forward ignores them
        "potential_energy": jax.random.normal(k_energy, (B, 1), dtype=jnp.float32),
        "potential_energy_uncertainty": unc,
    }

    # --- primary (zero-HLO) path -------------------------------------------
    out = uncertainty_forward(model_output)
    out = jax.block_until_ready(out)
    ref_np = np.asarray(jax.device_get(out))
    assert out.shape == (B, N) and out.dtype == jnp.float32
    assert np.array_equal(ref_np, np.asarray(jax.device_get(unc)))

    # --- debug Pallas path (no donation: original array stays valid) -------
    out_pallas = uncertainty_forward(model_output, use_pallas=True)
    out_pallas = jax.block_until_ready(out_pallas)
    out_pallas_np = np.asarray(jax.device_get(out_pallas))
    assert out_pallas_np.shape == ref_np.shape
    assert out_pallas_np.dtype == ref_np.dtype
    assert np.array_equal(out_pallas_np, ref_np)
    # caller's original tensor is untouched (no input_output_aliases)
    assert np.array_equal(np.asarray(jax.device_get(unc)), ref_np)

    print("KERNEL_OK")
</pallas_src>

<mosaic_0001>
module attributes {stable_mosaic.version = 11 : i64} {
  func.func @_identity_kernel(%arg0: memref<8x128xf32, #tpu.memory_space<vmem>>, %arg1: memref<8x128xf32, #tpu.memory_space<vmem>>) attributes {dimension_semantics = [], scalar_prefetch = 0 : i64, scratch_operands = 0 : i64, tpu.core_type = #tpu.core_type<tc>} {
    %c0 = arith.constant 0 : index
    %c0_0 = arith.constant 0 : index
    %0 = vector.load %arg0[%c0, %c0_0] : memref<8x128xf32, #tpu.memory_space<vmem>>, vector<8x128xf32>
    %c0_1 = arith.constant 0 : index
    %c0_2 = arith.constant 0 : index
    %1 = vector.load %arg1[%c0_1, %c0_2] : memref<8x128xf32, #tpu.memory_space<vmem>>, vector<8x128xf32>
    tpu.vector_store %arg1[%c0_1, %c0_2], %0 {strides = array<i32>} : memref<8x128xf32, #tpu.memory_space<vmem>>, vector<8x128xf32>,
    return
  }
}

</mosaic_0001>

<bundles_post_ra>
// kernel: tpu_custom_call.1
= control target key start
LH: loop header
LB: loop body
LE: loop exit
PB: predicated region body
PF: predicated region fallthrough
CT: control target
= control target key end

     0   :  { %6 = vsyncpa [#allocation3], 0  ;;  %s124_s0 = inlined_call_operand.hbm [shape: f32[8,128], index: 0, kind: input, shape index: {}]   ;;  %s125_s1 = inlined_call_operand.hbm [shape: f32[8,128], index: 1, kind: output, shape index: {}]  }
   0x1   :  { %7 = vsyncpa [#allocation4], 0  ;;  %s88_s6 = smov [#allocation2]   ;;  %s40_s10 = scalar_lea.hbm %s124_s0, 128 }
   0x2   :  { %s14_s7 = sshll.u32 %s88_s6, 4  ;;  %p41_p0 = scmp.ne.s32.totalorder %s124_s0, %s40_s10  ;;  %s15_s7 = int_to_ptr.vmem [resolvable:$true] %s14_s7 }
   0x3   :  { %p44_p1 = scmp.lt.u32.totalorder %s40_s10, %s124_s0 }
   0x5   :  { %p46_p2 = pnand %p44_p1, %p41_p0 }
   0x7   :  { %49 = shalt.err (!%p46_p2)
}
   0x8   :  { %s50_s15 = scalar_lea.vmem %s15_s7, 128  ;;  %p55_p4 = scmp.lt.s32.totalorder %s15_s7, %s15_s7 }
   0x9   :  { %p51_p3 = scmp.ne.s32.totalorder %s15_s7, %s50_s15  ;;  %p56_p5 = scmp.lt.s32.totalorder %s50_s15, %s50_s15 }
   0xb   :  { %p57_p6 = por %p56_p5, %p55_p4 }
   0xd   :  { %p58_p7 = pnand %p57_p6, %p51_p3 }
   0xf   :  { %61 = shalt.err (!%p58_p7)
}
  0x10   :  { %17 = dma.hbm_to_vmem [thread:$0]  %s124_s0, 128, %s15_s7, [#allocation3]  }
  0x11   :  { %84 = dma.done.wait [#allocation3], 128  }
  0x12   :  { %85 = vsyncadd [#allocation3], 4294967168  ;;  %s89_s18 = smov [#allocation5]   ;;  %v21_v0 = vld [vmem:[#allocation2] sm:$0xff] }
  0x13   :  { %s29_s19 = sshll.u32 %s89_s18, 4  ;;  %22 = vst [vmem:[#allocation5] sm:$0xff] %v21_v0  ;;  %s30_s19 = int_to_ptr.vmem [resolvable:$true] %s29_s19 }
  0x14   :  { %s62_s20 = scalar_lea.vmem %s30_s19, 128  ;;  %p67_p9 = scmp.lt.s32.totalorder %s30_s19, %s30_s19 }
  0x15   :  { %p63_p8 = scmp.ne.s32.totalorder %s30_s19, %s62_s20  ;;  %p68_p10 = scmp.lt.s32.totalorder %s62_s20, %s62_s20 }
  0x17   :  { %p69_p11 = por %p68_p10, %p67_p9 }
  0x19   :  { %p70_p12 = pnand %p69_p11, %p63_p8 }
  0x1b   :  { %73 = shalt.err (!%p70_p12)
}
  0x1c   :  { %s74_s23 = scalar_lea.hbm %s125_s1, 128 }
  0x1d   :  { %p75_p13 = scmp.ne.s32.totalorder %s125_s1, %s74_s23  ;;  %p78_p0 = scmp.lt.u32.totalorder %s74_s23, %s125_s1 }
  0x1f   :  { %p80_p1 = pnand %p78_p0, %p75_p13 }
  0x21   :  { %83 = shalt.err (!%p80_p1)
}
  0x22   :  { %32 = dma.vmem_to_hbm [thread:$0]  %s30_s19, 128, %s125_s1, [#allocation4]  }
  0x23   :  { %86 = dma.done.wait [#allocation4], 128  }
  0x24   :  { %87 = vsyncadd [#allocation4], 4294967168 }
  0x25   :  { %36 = vsyncpa [#allocation3], 1 }
  0x26   :  { %37 = vsyncpa [#allocation4], 1 }

</bundles_post_ra>
